<compile_context>
chip_gen: v7x
topology: tpu7x:2x2x1
jax: 0.10.0
libtpu: 0.0.40
codegen_flags: <defaults>
</compile_context>

<pallas_src>
import jax
import jax.numpy as jnp
from jax import lax
from jax.experimental import pallas as pl
from jax.experimental.pallas import tpu as pltpu

# ---------------- problem sizes (small, per prompt) ----------------
N = 2              # batch
C_IN = 4           # input channels
H = W = 16         # spatial
K = 32             # conv output channels ("features" width)
NUM_CLASSES = 10
NC_PAD = 128       # lane-dense padded classifier width
TAPS = 9           # 3x3 conv
M = N * H * W      # 512 rows (batch folded into matmul M dim)
CK = TAPS * C_IN   # 36 im2col contraction dim


def basenet_kernel(patches_ref, wconv_ref, bconv_ref, pool_ref,
                   wfc_ref, bfc_ref, out_ref):
    """Single grid step: whole batch fused into three MXU matmuls.

    patches_ref: (M, CK)      im2col patches, batch folded into rows
    wconv_ref  : (CK, K)      3x3 conv weight, tap-major x channel
    bconv_ref  : (1, K)       conv bias
    pool_ref   : (N, M)       block pooling matrix (1/(H*W) folded in)
    wfc_ref    : (K, NC_PAD)  classifier weight, zero-padded to 128 lanes
    bfc_ref    : (1, NC_PAD)  classifier bias, zero-padded
    out_ref    : (N, NC_PAD)  padded logits (single unmasked full-block store)
    """
    # features: conv as one matmul + bias + ReLU
    feat = jnp.dot(patches_ref[...], wconv_ref[...],
                   preferred_element_type=jnp.float32)          # (M, K)
    feat = jnp.maximum(feat + bconv_ref[...], 0.0)

    # avgpool: per-image mean via MXU matmul with the pooling matrix
    pooled = jnp.dot(pool_ref[...], feat,
                     preferred_element_type=jnp.float32)        # (N, K)

    # classifier: Linear(K -> NC_PAD), single lane-dense full-block store
    out_ref[...] = jnp.dot(pooled, wfc_ref[...],
                           preferred_element_type=jnp.float32) + bfc_ref[...]


def basenet_forward(x_nchw, w_conv, b_conv, w_fc, b_fc):
    """x_nchw: (N, C_IN, H, W) float32.  Returns {'logits': (N, NUM_CLASSES)}."""
    # ---- glue / layout plumbing (plain JAX, fused cheaply by XLA) ----
    x_nhwc = jnp.transpose(x_nchw, (0, 2, 3, 1))                   # (N,H,W,C)
    x_pad = jnp.pad(x_nhwc, ((0, 0), (1, 1), (1, 1), (0, 0)))      # (N,H+2,W+2,C)

    # im2col: tap-major then channel -> (N*H*W, 9*C_IN)
    taps = [x_pad[:, dy:dy + H, dx:dx + W, :]
            for dy in range(3) for dx in range(3)]                 # 9 x (N,H,W,C)
    patches = jnp.concatenate(taps, axis=-1).reshape(M, CK)        # (512, 36)

    # conv weight (K, C, 3, 3) -> (3, 3, C, K) -> (9*C, K), tap-major x channel
    w_conv_2d = jnp.transpose(w_conv, (2, 3, 1, 0)).reshape(CK, K)
    b_conv_2d = b_conv.reshape(1, K)

    # block pooling matrix: P[n, n*H*W:(n+1)*H*W] = 1/(H*W)
    pool_mat = jnp.kron(jnp.eye(N, dtype=jnp.float32),
                        jnp.ones((1, H * W), jnp.float32)) / float(H * W)  # (N, M)

    # classifier weight/bias, transposed and zero-padded to 128 lanes
    w_fc_pad = jnp.zeros((K, NC_PAD), jnp.float32).at[:, :NUM_CLASSES].set(w_fc.T)
    b_fc_pad = jnp.zeros((1, NC_PAD), jnp.float32).at[:, :NUM_CLASSES].set(b_fc)

    logits_pad = pl.pallas_call(
        basenet_kernel,
        out_shape=jax.ShapeDtypeStruct((N, NC_PAD), jnp.float32),
        grid_spec=pltpu.PrefetchScalarGridSpec(
            num_scalar_prefetch=0,
            grid=(1,),  # single step: fixed per-step overhead paid once
            in_specs=[
                pl.BlockSpec((M, CK), lambda i: (0, 0)),
                pl.BlockSpec((CK, K), lambda i: (0, 0)),
                pl.BlockSpec((1, K), lambda i: (0, 0)),
                pl.BlockSpec((N, M), lambda i: (0, 0)),
                pl.BlockSpec((K, NC_PAD), lambda i: (0, 0)),
                pl.BlockSpec((1, NC_PAD), lambda i: (0, 0)),
            ],
            out_specs=pl.BlockSpec((N, NC_PAD), lambda i: (0, 0)),
        ),
        compiler_params=pltpu.CompilerParams(
            dimension_semantics=("arbitrary",)),
    )(patches, w_conv_2d, b_conv_2d, pool_mat, w_fc_pad, b_fc_pad)

    return {'logits': logits_pad[:, :NUM_CLASSES]}


def reference_forward(x_nchw, w_conv, b_conv, w_fc, b_fc):
    """Pure-JAX reference matching the PyTorch semantics."""
    y = lax.conv_general_dilated(
        x_nchw, w_conv, window_strides=(1, 1), padding=((1, 1), (1, 1)),
        dimension_numbers=('NCHW', 'OIHW', 'NCHW'))
    y = y + b_conv.reshape(1, K, 1, 1)
    y = jnp.maximum(y, 0.0)
    pooled = jnp.mean(y, axis=(2, 3))            # (N, K)  == avgpool + view
    logits = pooled @ w_fc.T + b_fc              # (N, NUM_CLASSES)
    return logits


if __name__ == "__main__":
    key = jax.random.PRNGKey(0)
    kx, kw1, kb1, kw2, kb2 = jax.random.split(key, 5)

    x = jax.random.normal(kx, (N, C_IN, H, W), dtype=jnp.float32)
    w_conv = jax.random.normal(kw1, (K, C_IN, 3, 3), dtype=jnp.float32) * 0.1
    b_conv = jax.random.normal(kb1, (K,), dtype=jnp.float32) * 0.1
    w_fc = jax.random.normal(kw2, (NUM_CLASSES, K), dtype=jnp.float32) * 0.1
    b_fc = jax.random.normal(kb2, (NUM_CLASSES,), dtype=jnp.float32) * 0.1

    out = basenet_forward(x, w_conv, b_conv, w_fc, b_fc)
    logits = jax.block_until_ready(out['logits'])

    ref = reference_forward(x, w_conv, b_conv, w_fc, b_fc)
    assert logits.shape == (N, NUM_CLASSES)
    assert jnp.max(jnp.abs(logits - ref)) < 1e-3, "mismatch vs reference"

    print("KERNEL_OK")
</pallas_src>

<mosaic_0001>
module attributes {stable_mosaic.version = 11 : i64} {
  func.func @basenet_kernel(%arg0: i32, %arg1: memref<512x36xf32, #tpu.memory_space<vmem>>, %arg2: memref<36x32xf32, #tpu.memory_space<vmem>>, %arg3: memref<1x32xf32, #tpu.memory_space<vmem>>, %arg4: memref<2x512xf32, #tpu.memory_space<vmem>>, %arg5: memref<32x128xf32, #tpu.memory_space<vmem>>, %arg6: memref<1x128xf32, #tpu.memory_space<vmem>>, %arg7: memref<2x128xf32, #tpu.memory_space<vmem>>) attributes {dimension_semantics = [#tpu.dimension_semantics<arbitrary>], iteration_bounds = array<i64: 1>, scalar_prefetch = 0 : i64, scratch_operands = 0 : i64, tpu.core_type = #tpu.core_type<tc>, window_params = [{pipeline_mode = #tpu.pipeline_mode<synchronous>, transform_indices = @transform_0, window_bounds = array<i64: 512, 36>}, {pipeline_mode = #tpu.pipeline_mode<synchronous>, transform_indices = @transform_1, window_bounds = array<i64: 36, 32>}, {pipeline_mode = #tpu.pipeline_mode<synchronous>, transform_indices = @transform_2, window_bounds = array<i64: 1, 32>}, {pipeline_mode = #tpu.pipeline_mode<synchronous>, transform_indices = @transform_3, window_bounds = array<i64: 2, 512>}, {pipeline_mode = #tpu.pipeline_mode<synchronous>, transform_indices = @transform_4, window_bounds = array<i64: 32, 128>}, {pipeline_mode = #tpu.pipeline_mode<synchronous>, transform_indices = @transform_5, window_bounds = array<i64: 1, 128>}, {pipeline_mode = #tpu.pipeline_mode<synchronous>, transform_indices = @transform_6, window_bounds = array<i64: 2, 128>}]} {
    %c0 = arith.constant 0 : index
    %c0_0 = arith.constant 0 : index
    %0 = vector.load %arg1[%c0, %c0_0] : memref<512x36xf32, #tpu.memory_space<vmem>>, vector<512x36xf32>
    %c0_1 = arith.constant 0 : index
    %c0_2 = arith.constant 0 : index
    %1 = vector.load %arg2[%c0_1, %c0_2] : memref<36x32xf32, #tpu.memory_space<vmem>>, vector<36x32xf32>
    %cst = arith.constant dense<0.000000e+00> : vector<512x32xf32>
    %2 = tpu.matmul %0, %1, %cst {dimension_numbers = #tpu.dot_dimension_numbers<[1], [0], [0], [1], [0, 0, 1, 1], [], []>} : vector<512x36xf32>, vector<36x32xf32>, vector<512x32xf32> -> vector<512x32xf32>
    %c0_3 = arith.constant 0 : index
    %c0_4 = arith.constant 0 : index
    %3 = vector.load %arg3[%c0_3, %c0_4] : memref<1x32xf32, #tpu.memory_space<vmem>>, vector<1x32xf32>
    %4 = vector.broadcast %3 : vector<1x32xf32> to vector<512x32xf32>
    %5 = arith.addf %2, %4 : vector<512x32xf32>
    %cst_5 = arith.constant 0.000000e+00 : f32
    %6 = vector.broadcast %cst_5 : f32 to vector<512x32xf32>
    %7 = arith.maximumf %5, %6 : vector<512x32xf32>
    %c0_6 = arith.constant 0 : index
    %c0_7 = arith.constant 0 : index
    %8 = vector.load %arg4[%c0_6, %c0_7] : memref<2x512xf32, #tpu.memory_space<vmem>>, vector<2x512xf32>
    %cst_8 = arith.constant dense<0.000000e+00> : vector<2x32xf32>
    %9 = tpu.matmul %8, %7, %cst_8 {dimension_numbers = #tpu.dot_dimension_numbers<[1], [0], [0], [1], [0, 0, 1, 1], [], []>} : vector<2x512xf32>, vector<512x32xf32>, vector<2x32xf32> -> vector<2x32xf32>
    %c0_9 = arith.constant 0 : index
    %c0_10 = arith.constant 0 : index
    %10 = vector.load %arg5[%c0_9, %c0_10] : memref<32x128xf32, #tpu.memory_space<vmem>>, vector<32x128xf32>
    %cst_11 = arith.constant dense<0.000000e+00> : vector<2x128xf32>
    %11 = tpu.matmul %9, %10, %cst_11 {dimension_numbers = #tpu.dot_dimension_numbers<[1], [0], [0], [1], [0, 0, 1, 1], [], []>} : vector<2x32xf32>, vector<32x128xf32>, vector<2x128xf32> -> vector<2x128xf32>
    %c0_12 = arith.constant 0 : index
    %c0_13 = arith.constant 0 : index
    %12 = vector.load %arg6[%c0_12, %c0_13] : memref<1x128xf32, #tpu.memory_space<vmem>>, vector<1x128xf32>
    %13 = vector.broadcast %12 : vector<1x128xf32> to vector<2x128xf32>
    %14 = arith.addf %11, %13 : vector<2x128xf32>
    %c0_14 = arith.constant 0 : index
    %c0_15 = arith.constant 0 : index
    %15 = vector.load %arg7[%c0_14, %c0_15] : memref<2x128xf32, #tpu.memory_space<vmem>>, vector<2x128xf32>
    tpu.vector_store %arg7[%c0_14, %c0_15], %14 {strides = array<i32>} : memref<2x128xf32, #tpu.memory_space<vmem>>, vector<2x128xf32>,
    return
  }
  func.func @transform_0(%arg0: i32) -> (i32, i32) {
    %c0_i32 = arith.constant 0 : i32
    %c0_i32_0 = arith.constant 0 : i32
    %c0_i32_1 = arith.constant 0 : i32
    return %c0_i32, %c0_i32_0 : i32, i32
  }
  func.func @transform_1(%arg0: i32) -> (i32, i32) {
    %c0_i32 = arith.constant 0 : i32
    %c0_i32_0 = arith.constant 0 : i32
    %c0_i32_1 = arith.constant 0 : i32
    return %c0_i32, %c0_i32_0 : i32, i32
  }
  func.func @transform_2(%arg0: i32) -> (i32, i32) {
    %c0_i32 = arith.constant 0 : i32
    %c0_i32_0 = arith.constant 0 : i32
    %c0_i32_1 = arith.constant 0 : i32
    return %c0_i32, %c0_i32_0 : i32, i32
  }
  func.func @transform_3(%arg0: i32) -> (i32, i32) {
    %c0_i32 = arith.constant 0 : i32
    %c0_i32_0 = arith.constant 0 : i32
    %c0_i32_1 = arith.constant 0 : i32
    return %c0_i32, %c0_i32_0 : i32, i32
  }
  func.func @transform_4(%arg0: i32) -> (i32, i32) {
    %c0_i32 = arith.constant 0 : i32
    %c0_i32_0 = arith.constant 0 : i32
    %c0_i32_1 = arith.constant 0 : i32
    return %c0_i32, %c0_i32_0 : i32, i32
  }
  func.func @transform_5(%arg0: i32) -> (i32, i32) {
    %c0_i32 = arith.constant 0 : i32
    %c0_i32_0 = arith.constant 0 : i32
    %c0_i32_1 = arith.constant 0 : i32
    return %c0_i32, %c0_i32_0 : i32, i32
  }
  func.func @transform_6(%arg0: i32) -> (i32, i32) {
    %c0_i32 = arith.constant 0 : i32
    %c0_i32_0 = arith.constant 0 : i32
    %c0_i32_1 = arith.constant 0 : i32
    return %c0_i32, %c0_i32_0 : i32, i32
  }
}

</mosaic_0001>

<bundles_post_ra>
// kernel: tpu_custom_call.1
= control target key start
LH: loop header
LB: loop body
LE: loop exit
PB: predicated region body
PF: predicated region fallthrough
CT: control target
= control target key end

     0   :  { %vm100_vm0 = vcmask 293888   ;;  %vm293_vm1 = vcmask 1043456   ;;  %s1926_s0 = inlined_call_operand.vmem [shape: f32[512,36], index: 0, kind: input, shape index: {}]   ;;  %s1927_s1 = inlined_call_operand.vmem [shape: f32[36,32], index: 1, kind: input, shape index: {}]   ;;  %s1928_s2 = inlined_call_operand.vmem [shape: f32[1,32], index: 2, kind: input, shape index: {}]   ;;  %s1929_s3 = inlined_call_operand.vmem [shape: f32[2,512], index: 3, kind: input, shape index: {}]   ;;  %s1930_s4 = inlined_call_operand.vmem [shape: f32[32,128], index: 4, kind: input, shape index: {}]   ;;  %s1931_s5 = inlined_call_operand.vmem [shape: f32[1,128], index: 5, kind: input, shape index: {}]   ;;  %s1932_s6 = inlined_call_operand.hbm [shape: f32[2,128], index: 6, kind: output, shape index: {}]  }
   0x1   :  { %v88_v0 = vld [vmem:[%s1927_s1] sm:$0xff]  ;;  %v89_v1 = vld [vmem:[%s1927_s1 + $0x8] sm:$0xff]  ;;  %v90_v2 = vld [vmem:[%s1927_s1 + $0x10] sm:$0xff] }
   0x2   :  { %v1338_v3 = vpack.c.bf16 %v89_v1, %v88_v0  ;;  %v91_v4 = vld [vmem:[%s1927_s1 + $0x18] sm:$0xff]  ;;  %v24_v5 = vld [vmem:[%s1926_s0] sm:$0xff]  ;;  %v25_v8 = vld [vmem:[%s1926_s0 + $0x8] sm:$0xff] }
   0x3   :  { %v1342_v6 = vpack.c.bf16 %v91_v4, %v90_v2  ;;  %1231 = vmatprep.mubr.msk.f32.mxu0 %vm100_vm0, %v24_v5  ;;  %v92_v7 = vld [vmem:[%s1927_s1 + $0x20] sm:$0xf]  ;;  %v26_v9 = vld [vmem:[%s1926_s0 + $0x10] sm:$0xff]  ;;  %v69_v11 = vld [vmem:[%s1926_s0 + $0x168] sm:$0xff] }
   0x4   :  { %1339 = vmatprep.subr.bf16.mxu0 %v1338_v3  ;;  %1416 = vmatprep.subr.bf16.mxu1 %v1338_v3  ;;  %v68_v10 = vld [vmem:[%s1926_s0 + $0x160] sm:$0xff]  ;;  %v70_v12 = vld [vmem:[%s1926_s0 + $0x170] sm:$0xff]  ;;  %v27_v13 = vld [vmem:[%s1926_s0 + $0x18] sm:$0xff] }
   0x5   :  { %1341 = vmatpush3.bf16.msra.mxu0 %v1338_v3  ;;  %1419 = vmatpush3.bf16.msra.mxu1 %v1338_v3  ;;  %v28_v14 = vld [vmem:[%s1926_s0 + $0x20] sm:$0xff]  ;;  %v71_v15 = vld [vmem:[%s1926_s0 + $0x178] sm:$0xff]  ;;  %v29_v17 = vld [vmem:[%s1926_s0 + $0x28] sm:$0xff] }
   0x6   :  { %1343 = vmatprep.subr.bf16.mxu0 %v1342_v6  ;;  %1417 = vmatprep.subr.bf16.mxu1 %v1342_v6  ;;  %v72_v16 = vld [vmem:[%s1926_s0 + $0x180] sm:$0xff]  ;;  %v30_v18 = vld [vmem:[%s1926_s0 + $0x30] sm:$0xff]  ;;  %v73_v19 = vld [vmem:[%s1926_s0 + $0x188] sm:$0xff] }
   0x7   :  { %1297 = vmatprep.mubr.msk.f32.mxu1 %vm100_vm0, %v68_v10  ;;  %v74_v20 = vld [vmem:[%s1926_s0 + $0x190] sm:$0xff]  ;;  %v31_v21 = vld [vmem:[%s1926_s0 + $0x38] sm:$0xff]  ;;  %v32_v22 = vld [vmem:[%s1926_s0 + $0x40] sm:$0xff] }
   0x8   :  { %v75_v23 = vld [vmem:[%s1926_s0 + $0x198] sm:$0xff] }
   0x9   :  { %1345 = vmatpush3.bf16.msra.mxu0 %v1342_v6  ;;  %1420 = vmatpush3.bf16.msra.mxu1 %v1342_v6 }
   0xa   :  { %1229 = vmatprep.subr.msk.mxu0 %vm293_vm1, %v92_v7  ;;  %1418 = vmatprep.subr.msk.mxu1 %vm293_vm1, %v92_v7 }
   0xd   :  { %1230 = vmatpush3.msk.msra.mxu0 %vm293_vm1, %v92_v7  ;;  %1421 = vmatpush3.msk.msra.mxu1 %vm293_vm1, %v92_v7 }
   0xe   :  { %1232 = vmatmul.mubr.msk.f32.vlgmr.msra.gmra.mrb[0].mxu0 %vm100_vm0, %v25_v8  ;;  %1298 = vmatmul.mubr.msk.f32.vlgmr.msra.gmra.mrb[0].mxu1 %vm100_vm0, %v69_v11 }
   0xf   :  { %1234 = vmatprep.mubr.msk.f32.mxu0 %vm100_vm0, %v26_v9  ;;  %1300 = vmatprep.mubr.msk.f32.mxu1 %vm100_vm0, %v70_v12 }
  0x12   :  { %1235 = vmatmul.mubr.msk.f32.gmra.mrb[2].mxu0 %vm100_vm0, %v27_v13  ;;  %1301 = vmatmul.mubr.msk.f32.gmra.mrb[2].mxu1 %vm100_vm0, %v71_v15 }
  0x13   :  { %1237 = vmatprep.mubr.msk.f32.mxu0 %vm100_vm0, %v28_v14  ;;  %1303 = vmatprep.mubr.msk.f32.mxu1 %vm100_vm0, %v72_v16 }
  0x16   :  { %1238 = vmatmul.mubr.msk.f32.gmra.mrb[4].mxu0 %vm100_vm0, %v29_v17  ;;  %1304 = vmatmul.mubr.msk.f32.gmra.mrb[4].mxu1 %vm100_vm0, %v73_v19 }
  0x17   :  { %1240 = vmatprep.mubr.msk.f32.mxu0 %vm100_vm0, %v30_v18  ;;  %1306 = vmatprep.mubr.msk.f32.mxu1 %vm100_vm0, %v74_v20 }
  0x18   :  { %11 = vsyncpa [#allocation3], 0  ;;  %v76_v24 = vld [vmem:[%s1926_s0 + $0x1a0] sm:$0xff]  ;;  %v33_v25 = vld [vmem:[%s1926_s0 + $0x48] sm:$0xff]  ;;  %v1452_v7 = vmov 1983009808   ;;  %v752_v9 = vlaneseq }
  0x19   :  { %v34_v26 = vld [vmem:[%s1926_s0 + $0x50] sm:$0xff]  ;;  %v77_v27 = vld [vmem:[%s1926_s0 + $0x1a8] sm:$0xff]  ;;  %v35_v29 = vld [vmem:[%s1926_s0 + $0x58] sm:$0xff]  ;;  %v750_v8 = vunpack.c.l.s4 %v1452_v7  ;;  %vm1454_vm2 = vmmov 0   ;;  %vm920_vm3 = vcmask 261120   ;;  %s1456_s20 = smov [#allocation2]  }
  0x1a   :  { %1241 = vmatmul.mubr.msk.f32.gmra.mrb[6].mxu0 %vm100_vm0, %v31_v21  ;;  %1307 = vmatmul.mubr.msk.f32.gmra.mrb[6].mxu1 %vm100_vm0, %v75_v23  ;;  %v78_v28 = vld [vmem:[%s1926_s0 + $0x1b0] sm:$0xff]  ;;  %v36_v30 = vld [vmem:[%s1926_s0 + $0x60] sm:$0xff]  ;;  %v79_v31 = vld [vmem:[%s1926_s0 + $0x1b8] sm:$0xff]  ;;  %v753_v11 = vshrl.u32 %v752_v9, 7 }
  0x1b   :  { %1243 = vmatprep.mubr.msk.f32.mxu0 %vm100_vm0, %v32_v22  ;;  %1309 = vmatprep.mubr.msk.f32.mxu1 %vm100_vm0, %v76_v24  ;;  %v80_v32 = vld [vmem:[%s1926_s0 + $0x1c0] sm:$0xff]  ;;  %v37_v33 = vld [vmem:[%s1926_s0 + $0x68] sm:$0xff]  ;;  %v38_v34 = vld [vmem:[%s1926_s0 + $0x70] sm:$0xff]  ;;  %v751_v10 = vunpack.c.0.s8 %v750_v8 }
  0x1c   :  { %v81_v35 = vld [vmem:[%s1926_s0 + $0x1c8] sm:$0xff]  ;;  %v82_v36 = vld [vmem:[%s1926_s0 + $0x1d0] sm:$0xff]  ;;  %v39_v37 = vld [vmem:[%s1926_s0 + $0x78] sm:$0xff] }
  0x1d   :  { %v40_v38 = vld [vmem:[%s1926_s0 + $0x80] sm:$0xff]  ;;  %v83_v39 = vld [vmem:[%s1926_s0 + $0x1d8] sm:$0xff]  ;;  %v41_v41 = vld [vmem:[%s1926_s0 + $0x88] sm:$0xff]  ;;  %v754_v12 = vsub.s32 %v751_v10, %v753_v11 }
  0x1e   :  { %1244 = vmatmul.mubr.msk.f32.gmra.mrb[8].mxu0 %vm100_vm0, %v33_v25  ;;  %1310 = vmatmul.mubr.msk.f32.gmra.mrb[8].mxu1 %vm100_vm0, %v77_v27  ;;  %v84_v40 = vld [vmem:[%s1926_s0 + $0x1e0] sm:$0xff]  ;;  %v42_v42 = vld [vmem:[%s1926_s0 + $0x90] sm:$0xff]  ;;  %v85_v43 = vld [vmem:[%s1926_s0 + $0x1e8] sm:$0xff] }
  0x1f   :  { %1246 = vmatprep.mubr.msk.f32.mxu0 %vm100_vm0, %v34_v26  ;;  %1312 = vmatprep.mubr.msk.f32.mxu1 %vm100_vm0, %v78_v28  ;;  %v86_v44 = vld [vmem:[%s1926_s0 + $0x1f0] sm:$0xff]  ;;  %v43_v45 = vld [vmem:[%s1926_s0 + $0x98] sm:$0xff]  ;;  %v44_v46 = vld [vmem:[%s1926_s0 + $0xa0] sm:$0xff] }
  0x20   :  { %v87_v47 = vld [vmem:[%s1926_s0 + $0x1f8] sm:$0xff]  ;;  %v45_v48 = vld [vmem:[%s1926_s0 + $0xa8] sm:$0xff]  ;;  %v46_v49 = vld [vmem:[%s1926_s0 + $0xb0] sm:$0xff] }
  0x21   :  { %v47_v50 = vld [vmem:[%s1926_s0 + $0xb8] sm:$0xff]  ;;  %v48_v51 = vld [vmem:[%s1926_s0 + $0xc0] sm:$0xff]  ;;  %v49_v52 = vld [vmem:[%s1926_s0 + $0xc8] sm:$0xff] }
  0x22   :  { %1247 = vmatmul.mubr.msk.f32.gmra.mrb[10].mxu0 %vm100_vm0, %v35_v29  ;;  %1313 = vmatmul.mubr.msk.f32.gmra.mrb[10].mxu1 %vm100_vm0, %v79_v31  ;;  %v50_v53 = vld [vmem:[%s1926_s0 + $0xd0] sm:$0xff]  ;;  %v51_v54 = vld [vmem:[%s1926_s0 + $0xd8] sm:$0xff]  ;;  %v52_v55 = vld [vmem:[%s1926_s0 + $0xe0] sm:$0xff] }
  0x23   :  { %1249 = vmatprep.mubr.msk.f32.mxu0 %vm100_vm0, %v36_v30  ;;  %1315 = vmatprep.mubr.msk.f32.mxu1 %vm100_vm0, %v80_v32  ;;  %v53_v56 = vld [vmem:[%s1926_s0 + $0xe8] sm:$0xff]  ;;  %v54_v57 = vld [vmem:[%s1926_s0 + $0xf0] sm:$0xff]  ;;  %v55_v58 = vld [vmem:[%s1926_s0 + $0xf8] sm:$0xff] }
  0x24   :  { %v56_v59 = vld [vmem:[%s1926_s0 + $0x100] sm:$0xff]  ;;  %v57_v60 = vld [vmem:[%s1926_s0 + $0x108] sm:$0xff]  ;;  %v58_v61 = vld [vmem:[%s1926_s0 + $0x110] sm:$0xff] }
  0x25   :  { %v59_v62 = vld [vmem:[%s1926_s0 + $0x118] sm:$0xff]  ;;  %v60_v63 = vld [vmem:[%s1926_s0 + $0x120] sm:$0xff]  ;;  %v61_v0 = vld [vmem:[%s1926_s0 + $0x128] sm:$0xff] }
  0x26   :  { %1250 = vmatmul.mubr.msk.f32.gmra.mrb[12].mxu0 %vm100_vm0, %v37_v33  ;;  %1316 = vmatmul.mubr.msk.f32.gmra.mrb[12].mxu1 %vm100_vm0, %v81_v35  ;;  %v62_v1 = vld [vmem:[%s1926_s0 + $0x130] sm:$0xff]  ;;  %v63_v2 = vld [vmem:[%s1926_s0 + $0x138] sm:$0xff]  ;;  %v64_v3 = vld [vmem:[%s1926_s0 + $0x140] sm:$0xff] }
  0x27   :  { %1252 = vmatprep.mubr.msk.f32.mxu0 %vm100_vm0, %v38_v34  ;;  %1318 = vmatprep.mubr.msk.f32.mxu1 %vm100_vm0, %v82_v36  ;;  %v65_v4 = vld [vmem:[%s1926_s0 + $0x148] sm:$0xff]  ;;  %v66_v5 = vld [vmem:[%s1926_s0 + $0x150] sm:$0xff]  ;;  %v67_v6 = vld [vmem:[%s1926_s0 + $0x158] sm:$0xff] }
  0x28   :  { %v746_v13 = vld [vmem:[%s1929_s3] sm:$0xff] }
  0x29   :  { %v1766_v14 = vrot.slane %v746_v13, %v754_v12  ;;  %v748_v16 = vcombine.high %v746_v13, %v746_v13  ;;  %v1775_v18 = vld [vmem:[%s1928_s2] ss:$0 sm:$0xff] }
  0x2a   :  { %1253 = vmatmul.mubr.msk.f32.gmra.mrb[14].mxu0 %vm100_vm0, %v39_v37  ;;  %1319 = vmatmul.mubr.msk.f32.gmra.mrb[14].mxu1 %vm100_vm0, %v83_v39 }
  0x2b   :  { %1255 = vmatprep.mubr.msk.f32.mxu0 %vm100_vm0, %v40_v38  ;;  %1321 = vmatprep.mubr.msk.f32.mxu1 %vm100_vm0, %v84_v40  ;;  %v763_v15 = vcombine.high %v1766_v14, %v1766_v14  ;;  %v1770_v17 = vrot.slane %v748_v16, %v754_v12 }
  0x2e   :  { %1256 = vmatmul.mubr.msk.f32.gmra.mrb[16].mxu0 %vm100_vm0, %v41_v41  ;;  %1322 = vmatmul.mubr.msk.f32.gmra.mrb[16].mxu1 %vm100_vm0, %v85_v43 }
  0x2f   :  { %1258 = vmatprep.mubr.msk.f32.mxu0 %vm100_vm0, %v42_v42  ;;  %1324 = vmatprep.mubr.msk.f32.mxu1 %vm100_vm0, %v86_v44 }
  0x32   :  { %1259 = vmatmul.mubr.msk.f32.gmra.mrb[18].mxu0 %vm100_vm0, %v43_v45  ;;  %1325 = vmatmul.mubr.msk.f32.gmra.mrb[18].mxu1 %vm100_vm0, %v87_v47 }
  0x33   :  { %1261 = vmatprep.mubr.msk.f32.mxu0 %vm100_vm0, %v44_v46  ;;  %833 = vmatprep.mubr.f32.mxu1 %v763_v15 }
  0x36   :  { %1262 = vmatmul.mubr.msk.f32.gmra.mrb[20].mxu0 %vm100_vm0, %v45_v48 }
  0x37   :  { %1264 = vmatprep.mubr.msk.f32.mxu0 %vm100_vm0, %v46_v49 }
  0x3a   :  { %1265 = vmatmul.mubr.msk.f32.gmra.mrb[22].mxu0 %vm100_vm0, %v47_v50 }
  0x3b   :  { %1267 = vmatprep.mubr.msk.f32.mxu0 %vm100_vm0, %v48_v51 }
  0x3e   :  { %1268 = vmatmul.mubr.msk.f32.gmra.mrb[24].mxu0 %vm100_vm0, %v49_v52 }
  0x3f   :  { %1270 = vmatprep.mubr.msk.f32.mxu0 %vm100_vm0, %v50_v53 }
  0x42   :  { %1271 = vmatmul.mubr.msk.f32.gmra.mrb[26].mxu0 %vm100_vm0, %v51_v54 }
  0x43   :  { %1273 = vmatprep.mubr.msk.f32.mxu0 %vm100_vm0, %v52_v55 }
  0x46   :  { %1274 = vmatmul.mubr.msk.f32.gmra.mrb[28].mxu0 %vm100_vm0, %v53_v56 }
  0x47   :  { %1276 = vmatprep.mubr.msk.f32.mxu0 %vm100_vm0, %v54_v57 }
  0x4a   :  { %1277 = vmatmul.mubr.msk.f32.gmra.mrb[30].mxu0 %vm100_vm0, %v55_v58 }
  0x4b   :  { %1279 = vmatprep.mubr.msk.f32.mxu0 %vm100_vm0, %v56_v59 }
  0x4e   :  { %1280 = vmatmul.mubr.msk.f32.gmra.mrb[32].mxu0 %vm100_vm0, %v57_v60 }
  0x4f   :  { %1282 = vmatprep.mubr.msk.f32.mxu0 %vm100_vm0, %v58_v61 }
  0x52   :  { %1283 = vmatmul.mubr.msk.f32.gmra.mrb[34].mxu0 %vm100_vm0, %v59_v62 }
  0x53   :  { %1285 = vmatprep.mubr.msk.f32.mxu0 %vm100_vm0, %v60_v63 }
  0x56   :  { %1286 = vmatmul.mubr.msk.f32.gmra.mrb[36].mxu0 %vm100_vm0, %v61_v0 }
  0x57   :  { %1288 = vmatprep.mubr.msk.f32.mxu0 %vm100_vm0, %v62_v1 }
  0x5a   :  { %1289 = vmatmul.mubr.msk.f32.gmra.mrb[38].mxu0 %vm100_vm0, %v63_v2 }
  0x5b   :  { %1291 = vmatprep.mubr.msk.f32.mxu0 %vm100_vm0, %v64_v3 }
  0x5e   :  { %1292 = vmatmul.mubr.msk.f32.gmra.mrb[40].mxu0 %vm100_vm0, %v65_v4 }
  0x5f   :  { %1294 = vmatprep.mubr.msk.f32.mxu0 %vm100_vm0, %v66_v5 }
  0x62   :  { %1295 = vmatmul.mubr.msk.f32.gmra.mrb[42].mxu0 %vm100_vm0, %v67_v6 }
  0xe1   :  { %v1233_v19 = vpop.f32.mrb[0].mxu0  ;;  %v1299_v22 = vpop.f32.mrb[0].mxu1 }
  0xe2   :  { %v369_v20 = vadd.f32 %v1233_v19, %v1775_v18  ;;  %v363_v21 = vpop.f32.mrb[1].mxu0  ;;  %v589_v24 = vadd.f32 %v1299_v22, %v1775_v18  ;;  %v583_v25 = vpop.f32.mrb[1].mxu1 }
  0xe3   :  { %v364_v23 = vadd.f32 %v1775_v18, %v363_v21  ;;  %v584_v27 = vadd.f32 %v1775_v18, %v583_v25 }
  0xe4   :  { %v683_v26 = vmax.f32 %v369_v20, 0.0  ;;  %v727_v30 = vmax.f32 %v589_v24, 0.0 }
  0xe5   :  { %v682_v28 = vmax.f32 %v364_v23, 0.0  ;;  %v1236_v29 = vpop.f32.mrb[2].mxu0  ;;  %v726_v33 = vmax.f32 %v584_v27, 0.0  ;;  %v1302_v34 = vpop.f32.mrb[2].mxu1 }
  0xe6   :  { %v379_v31 = vadd.f32 %v1236_v29, %v1775_v18  ;;  %v373_v32 = vpop.f32.mrb[3].mxu0  ;;  %v599_v37 = vadd.f32 %v1302_v34, %v1775_v18  ;;  %v593_v38 = vpop.f32.mrb[3].mxu1 }
  0xe7   :  { %v1782_v35 = vpack.c.bf16 %v683_v26, %v682_v28  ;;  %v374_v36 = vadd.f32 %v1775_v18, %v373_v32  ;;  %v1786_v40 = vpack.c.bf16 %v727_v30, %v726_v33  ;;  %v594_v41 = vadd.f32 %v1775_v18, %v593_v38 }
  0xe8   :  { %v685_v39 = vmax.f32 %v379_v31, 0.0  ;;  %v729_v44 = vmax.f32 %v599_v37, 0.0 }
  0xe9   :  { %v684_v42 = vmax.f32 %v374_v36, 0.0  ;;  %v1239_v43 = vpop.f32.mrb[4].mxu0  ;;  %v728_v47 = vmax.f32 %v594_v41, 0.0  ;;  %v1305_v48 = vpop.f32.mrb[4].mxu1 }
  0xea   :  { %v389_v45 = vadd.f32 %v1239_v43, %v1775_v18  ;;  %v383_v46 = vpop.f32.mrb[5].mxu0  ;;  %v609_v51 = vadd.f32 %v1305_v48, %v1775_v18  ;;  %v603_v52 = vpop.f32.mrb[5].mxu1 }
  0xeb   :  { %v1790_v49 = vpack.c.bf16 %v685_v39, %v684_v42  ;;  %v384_v50 = vadd.f32 %v1775_v18, %v383_v46  ;;  %v1794_v54 = vpack.c.bf16 %v729_v44, %v728_v47  ;;  %v604_v55 = vadd.f32 %v1775_v18, %v603_v52 }
  0xec   :  { %v687_v53 = vmax.f32 %v389_v45, 0.0  ;;  %v731_v58 = vmax.f32 %v609_v51, 0.0 }
  0xed   :  { %v686_v56 = vmax.f32 %v384_v50, 0.0  ;;  %v1242_v57 = vpop.f32.mrb[6].mxu0  ;;  %v730_v61 = vmax.f32 %v604_v55, 0.0  ;;  %v1308_v62 = vpop.f32.mrb[6].mxu1 }
  0xee   :  { %v399_v59 = vadd.f32 %v1242_v57, %v1775_v18  ;;  %v393_v60 = vpop.f32.mrb[7].mxu0  ;;  %v619_v1 = vadd.f32 %v1308_v62, %v1775_v18  ;;  %v613_v2 = vpop.f32.mrb[7].mxu1 }
  0xef   :  { %v1798_v63 = vpack.c.bf16 %v687_v53, %v686_v56  ;;  %v394_v0 = vadd.f32 %v1775_v18, %v393_v60  ;;  %v1802_v4 = vpack.c.bf16 %v731_v58, %v730_v61  ;;  %v614_v5 = vadd.f32 %v1775_v18, %v613_v2 }
  0xf0   :  { %v689_v3 = vmax.f32 %v399_v59, 0.0  ;;  %v733_v8 = vmax.f32 %v619_v1, 0.0 }
  0xf1   :  { %v688_v6 = vmax.f32 %v394_v0, 0.0  ;;  %v1245_v7 = vpop.f32.mrb[8].mxu0  ;;  %v732_v11 = vmax.f32 %v614_v5, 0.0  ;;  %v1311_v12 = vpop.f32.mrb[8].mxu1 }
  0xf2   :  { %v409_v9 = vadd.f32 %v1245_v7, %v1775_v18  ;;  %v403_v10 = vpop.f32.mrb[9].mxu0  ;;  %v629_v16 = vadd.f32 %v1311_v12, %v1775_v18  ;;  %v623_v19 = vpop.f32.mrb[9].mxu1 }
  0xf3   :  { %v1806_v13 = vpack.c.bf16 %v689_v3, %v688_v6  ;;  %v404_v15 = vadd.f32 %v1775_v18, %v403_v10  ;;  %v1810_v21 = vpack.c.bf16 %v733_v8, %v732_v11  ;;  %v624_v22 = vadd.f32 %v1775_v18, %v623_v19 }
  0xf4   :  { %v691_v20 = vmax.f32 %v409_v9, 0.0  ;;  %v735_v25 = vmax.f32 %v629_v16, 0.0 }
  0xf5   :  { %v690_v23 = vmax.f32 %v404_v15, 0.0  ;;  %v1248_v24 = vpop.f32.mrb[10].mxu0  ;;  %v734_v28 = vmax.f32 %v624_v22, 0.0  ;;  %v1314_v29 = vpop.f32.mrb[10].mxu1 }
  0xf6   :  { %v419_v26 = vadd.f32 %v1248_v24, %v1775_v18  ;;  %v413_v27 = vpop.f32.mrb[11].mxu0  ;;  %v639_v32 = vadd.f32 %v1314_v29, %v1775_v18  ;;  %v633_v33 = vpop.f32.mrb[11].mxu1 }
  0xf7   :  { %v1814_v30 = vpack.c.bf16 %v691_v20, %v690_v23  ;;  %v414_v31 = vadd.f32 %v1775_v18, %v413_v27  ;;  %v1818_v36 = vpack.c.bf16 %v735_v25, %v734_v28  ;;  %v634_v37 = vadd.f32 %v1775_v18, %v633_v33 }
  0xf8   :  { %v693_v34 = vmax.f32 %v419_v26, 0.0  ;;  %v737_v41 = vmax.f32 %v639_v32, 0.0 }
  0xf9   :  { %v692_v38 = vmax.f32 %v414_v31, 0.0  ;;  %v1251_v39 = vpop.f32.mrb[12].mxu0  ;;  %v736_v44 = vmax.f32 %v634_v37, 0.0  ;;  %v1317_v45 = vpop.f32.mrb[12].mxu1 }
  0xfa   :  { %v429_v42 = vadd.f32 %v1251_v39, %v1775_v18  ;;  %v423_v43 = vpop.f32.mrb[13].mxu0  ;;  %v649_v48 = vadd.f32 %v1317_v45, %v1775_v18  ;;  %v643_v50 = vpop.f32.mrb[13].mxu1 }
  0xfb   :  { %v1822_v46 = vpack.c.bf16 %v693_v34, %v692_v38  ;;  %v424_v47 = vadd.f32 %v1775_v18, %v423_v43  ;;  %v1826_v52 = vpack.c.bf16 %v737_v41, %v736_v44  ;;  %v644_v53 = vadd.f32 %v1775_v18, %v643_v50 }
  0xfc   :  { %v695_v51 = vmax.f32 %v429_v42, 0.0  ;;  %v739_v57 = vmax.f32 %v649_v48, 0.0 }
  0xfd   :  { %v694_v55 = vmax.f32 %v424_v47, 0.0  ;;  %v1254_v56 = vpop.f32.mrb[14].mxu0  ;;  %v738_v60 = vmax.f32 %v644_v53, 0.0  ;;  %v1320_v61 = vpop.f32.mrb[14].mxu1 }
  0xfe   :  { %v439_v58 = vadd.f32 %v1254_v56, %v1775_v18  ;;  %v433_v59 = vpop.f32.mrb[15].mxu0  ;;  %v659_v1 = vadd.f32 %v1320_v61, %v1775_v18  ;;  %v653_v2 = vpop.f32.mrb[15].mxu1 }
  0xff   :  { %v1830_v62 = vpack.c.bf16 %v695_v51, %v694_v55  ;;  %v434_v0 = vadd.f32 %v1775_v18, %v433_v59  ;;  %v1834_v5 = vpack.c.bf16 %v739_v57, %v738_v60  ;;  %v654_v6 = vadd.f32 %v1775_v18, %v653_v2 }
 0x100   :  { %v697_v3 = vmax.f32 %v439_v58, 0.0  ;;  %v741_v9 = vmax.f32 %v659_v1, 0.0 }
 0x101   :  { %v696_v7 = vmax.f32 %v434_v0, 0.0  ;;  %v1257_v8 = vpop.f32.mrb[16].mxu0  ;;  %v740_v12 = vmax.f32 %v654_v6, 0.0  ;;  %v1323_v15 = vpop.f32.mrb[16].mxu1 }
 0x102   :  { %v449_v10 = vadd.f32 %v1257_v8, %v1775_v18  ;;  %v443_v11 = vpop.f32.mrb[17].mxu0  ;;  %v669_v20 = vadd.f32 %v1323_v15, %v1775_v18  ;;  %v663_v22 = vpop.f32.mrb[17].mxu1 }
 0x103   :  { %v1838_v16 = vpack.c.bf16 %v697_v3, %v696_v7  ;;  %v444_v19 = vadd.f32 %v1775_v18, %v443_v11  ;;  %v1842_v24 = vpack.c.bf16 %v741_v9, %v740_v12  ;;  %v664_v25 = vadd.f32 %v1775_v18, %v663_v22 }
 0x104   :  { %v699_v23 = vmax.f32 %v449_v10, 0.0  ;;  %v743_v28 = vmax.f32 %v669_v20, 0.0 }
 0x105   :  { %v698_v26 = vmax.f32 %v444_v19, 0.0  ;;  %v1260_v27 = vpop.f32.mrb[18].mxu0  ;;  %v742_v32 = vmax.f32 %v664_v25, 0.0  ;;  %v1326_v33 = vpop.f32.mrb[18].mxu1 }
 0x106   :  { %v459_v29 = vadd.f32 %v1260_v27, %v1775_v18  ;;  %v453_v31 = vpop.f32.mrb[19].mxu0  ;;  %v679_v38 = vadd.f32 %v1326_v33, %v1775_v18  ;;  %v673_v39 = vpop.f32.mrb[19].mxu1 }
 0x107   :  { %v1346_v34 = vpack.c.bf16 %v699_v23, %v698_v26  ;;  %v454_v37 = vadd.f32 %v1775_v18, %v453_v31  ;;  %v1848_v42 = vpack.c.bf16 %v743_v28, %v742_v32  ;;  %v674_v43 = vadd.f32 %v1775_v18, %v673_v39 }
 0x108   :  { %v701_v41 = vmax.f32 %v459_v29, 0.0  ;;  %v745_v47 = vmax.f32 %v679_v38, 0.0 }
 0x109   :  { %v700_v44 = vmax.f32 %v454_v37, 0.0  ;;  %v1263_v45 = vpop.f32.mrb[20].mxu0  ;;  %1347 = vmatprep.subr.bf16.mxu1 %v1346_v34  ;;  %v744_v51 = vmax.f32 %v674_v43, 0.0 }
 0x10a   :  { %v469_v48 = vadd.f32 %v1263_v45, %v1775_v18  ;;  %v463_v50 = vpop.f32.mrb[21].mxu0  ;;  %1349 = vmatpush3.bf16.msra.mxu1 %v1782_v35 }
 0x10b   :  { %v1350_v53 = vpack.c.bf16 %v701_v41, %v700_v44  ;;  %v464_v55 = vadd.f32 %v1775_v18, %v463_v50  ;;  %v1854_v57 = vpack.c.bf16 %v745_v47, %v744_v51 }
 0x10c   :  { %v703_v56 = vmax.f32 %v469_v48, 0.0 }
 0x10d   :  { %v702_v58 = vmax.f32 %v464_v55, 0.0  ;;  %v1266_v59 = vpop.f32.mrb[22].mxu0  ;;  %1351 = vmatprep.subr.bf16.mxu1 %v1350_v53  ;;  %v764_v53 = vcombine.high %v1770_v17, %v1770_v17 }
 0x10e   :  { %v479_v60 = vadd.f32 %v1266_v59, %v1775_v18  ;;  %v473_v61 = vpop.f32.mrb[23].mxu0  ;;  %1353 = vmatpush3.bf16.msra.mxu1 %v1790_v49 }
 0x10f   :  { %v1354_v0 = vpack.c.bf16 %v703_v56, %v702_v58  ;;  %v474_v1 = vadd.f32 %v1775_v18, %v473_v61 }
 0x110   :  { %v705_v2 = vmax.f32 %v479_v60, 0.0 }
 0x111   :  { %v704_v35 = vmax.f32 %v474_v1, 0.0  ;;  %v1269_v3 = vpop.f32.mrb[24].mxu0  ;;  %1355 = vmatprep.subr.bf16.mxu1 %v1354_v0 }
 0x112   :  { %v489_v6 = vadd.f32 %v1269_v3, %v1775_v18  ;;  %v483_v7 = vpop.f32.mrb[25].mxu0  ;;  %1357 = vmatpush3.bf16.msra.mxu1 %v1798_v63 }
 0x113   :  { %v1358_v8 = vpack.c.bf16 %v705_v2, %v704_v35  ;;  %v484_v9 = vadd.f32 %v1775_v18, %v483_v7 }
 0x114   :  { %v707_v10 = vmax.f32 %v489_v6, 0.0 }
 0x115   :  { %v706_v11 = vmax.f32 %v484_v9, 0.0  ;;  %v1272_v12 = vpop.f32.mrb[26].mxu0  ;;  %1359 = vmatprep.subr.bf16.mxu1 %v1358_v8 }
 0x116   :  { %v499_v49 = vadd.f32 %v1272_v12, %v1775_v18  ;;  %v493_v15 = vpop.f32.mrb[27].mxu0  ;;  %1361 = vmatpush3.bf16.msra.mxu1 %v1806_v13 }
 0x117   :  { %v1362_v19 = vpack.c.bf16 %v707_v10, %v706_v11  ;;  %v494_v20 = vadd.f32 %v1775_v18, %v493_v15 }
 0x118   :  { %v709_v22 = vmax.f32 %v499_v49, 0.0 }
 0x119   :  { %v708_v23 = vmax.f32 %v494_v20, 0.0  ;;  %v1275_v25 = vpop.f32.mrb[28].mxu0  ;;  %1363 = vmatprep.subr.bf16.mxu1 %v1362_v19 }
 0x11a   :  { %v509_v63 = vadd.f32 %v1275_v25, %v1775_v18  ;;  %v503_v26 = vpop.f32.mrb[29].mxu0  ;;  %1365 = vmatpush3.bf16.msra.mxu1 %v1814_v30 }
 0x11b   :  { %v1366_v27 = vpack.c.bf16 %v709_v22, %v708_v23  ;;  %v504_v28 = vadd.f32 %v1775_v18, %v503_v26 }
 0x11c   :  { %v711_v29 = vmax.f32 %v509_v63, 0.0 }
 0x11d   :  { %v710_v31 = vmax.f32 %v504_v28, 0.0  ;;  %v1278_v32 = vpop.f32.mrb[30].mxu0  ;;  %1367 = vmatprep.subr.bf16.mxu1 %v1366_v27 }
 0x11e   :  { %v519_v13 = vadd.f32 %v1278_v32, %v1775_v18  ;;  %v513_v33 = vpop.f32.mrb[31].mxu0  ;;  %1369 = vmatpush3.bf16.msra.mxu1 %v1822_v46 }
 0x11f   :  { %v1370_v34 = vpack.c.bf16 %v711_v29, %v710_v31  ;;  %v514_v37 = vadd.f32 %v1775_v18, %v513_v33  ;;  %v1075_v33 = vld [vmem:[%s1931_s5] ss:$0 sm:$0xff] }
 0x120   :  { %v713_v38 = vmax.f32 %v519_v13, 0.0 }
 0x121   :  { %v712_v39 = vmax.f32 %v514_v37, 0.0  ;;  %1371 = vmatprep.subr.bf16.mxu1 %v1370_v34  ;;  %v1281_v41 = vpop.f32.mrb[32].mxu0 }
 0x122   :  { %v529_v30 = vadd.f32 %v1281_v41, %v1775_v18  ;;  %1373 = vmatpush3.bf16.msra.mxu1 %v1830_v62  ;;  %v523_v43 = vpop.f32.mrb[33].mxu0 }
 0x123   :  { %v1374_v44 = vpack.c.bf16 %v713_v38, %v712_v39  ;;  %v524_v45 = vadd.f32 %v1775_v18, %v523_v43 }
 0x124   :  { %v715_v47 = vmax.f32 %v529_v30, 0.0 }
 0x125   :  { %v714_v48 = vmax.f32 %v524_v45, 0.0  ;;  %1375 = vmatprep.subr.bf16.mxu1 %v1374_v44  ;;  %v1284_v50 = vpop.f32.mrb[34].mxu0 }
 0x126   :  { %v539_v46 = vadd.f32 %v1284_v50, %v1775_v18  ;;  %1377 = vmatpush3.bf16.msra.mxu1 %v1838_v16  ;;  %v533_v51 = vpop.f32.mrb[35].mxu0 }
 0x127   :  { %v1380_v55 = vpack.c.bf16 %v715_v47, %v714_v48  ;;  %v534_v56 = vadd.f32 %v1775_v18, %v533_v51  ;;  %1379 = vmatprep.subr.bf16.mxu1 %v1802_v4 }
 0x128   :  { %v717_v62 = vmax.f32 %v539_v46, 0.0 }
 0x129   :  { %v716_v58 = vmax.f32 %v534_v56, 0.0  ;;  %v1287_v59 = vpop.f32.mrb[36].mxu0  ;;  %834 = vmatmul.mubr.f32.vlgmr.msra.gmra.mrb[20].mxu1 %v1766_v14 }
 0x12a   :  { %v549_v60 = vadd.f32 %v1287_v59, %v1775_v18  ;;  %1381 = vmatpush3.bf16.msra.mxu1 %v1380_v55  ;;  %v543_v61 = vpop.f32.mrb[37].mxu0  ;;  %903 = vmatprep.mubr.f32.mxu1 %v764_v53 }
 0x12b   :  { %v1384_v16 = vpack.c.bf16 %v717_v62, %v716_v58  ;;  %v544_v0 = vadd.f32 %v1775_v18, %v543_v61  ;;  %1383 = vmatprep.subr.bf16.mxu1 %v1810_v21 }
 0x12c   :  { %v719_v1 = vmax.f32 %v549_v60, 0.0 }
 0x12d   :  { %v718_v2 = vmax.f32 %v544_v0, 0.0  ;;  %v1290_v35 = vpop.f32.mrb[38].mxu0 }
 0x12e   :  { %v559_v4 = vadd.f32 %v1290_v35, %v1775_v18  ;;  %1385 = vmatpush3.bf16.msra.mxu1 %v1384_v16  ;;  %v553_v3 = vpop.f32.mrb[39].mxu0 }
 0x12f   :  { %v1388_v6 = vpack.c.bf16 %v719_v1, %v718_v2  ;;  %v554_v14 = vadd.f32 %v1775_v18, %v553_v3  ;;  %1387 = vmatprep.subr.bf16.mxu1 %v1818_v36 }
 0x130   :  { %v721_v7 = vmax.f32 %v559_v4, 0.0 }
 0x131   :  { %v720_v8 = vmax.f32 %v554_v14, 0.0  ;;  %v1293_v9 = vpop.f32.mrb[40].mxu0 }
 0x132   :  { %v569_v10 = vadd.f32 %v1293_v9, %v1775_v18  ;;  %1389 = vmatpush3.bf16.msra.mxu1 %v1388_v6  ;;  %v563_v11 = vpop.f32.mrb[41].mxu0 }
 0x133   :  { %v1392_v21 = vpack.c.bf16 %v721_v7, %v720_v8  ;;  %v564_v12 = vadd.f32 %v1775_v18, %v563_v11  ;;  %1391 = vmatprep.subr.bf16.mxu1 %v1826_v52  ;;  %v910_v52 = vld [vmem:[%s1930_s4 + $0x8] sm:$0xff] }
 0x134   :  { %v723_v49 = vmax.f32 %v569_v10, 0.0 }
 0x135   :  { %v722_v15 = vmax.f32 %v564_v12, 0.0  ;;  %v1296_v19 = vpop.f32.mrb[42].mxu0 }
 0x136   :  { %v579_v20 = vadd.f32 %v1296_v19, %v1775_v18  ;;  %1393 = vmatpush3.bf16.msra.mxu1 %v1392_v21  ;;  %v573_v22 = vpop.f32.mrb[43].mxu0 }
 0x137   :  { %v1396_v36 = vpack.c.bf16 %v723_v49, %v722_v15  ;;  %v574_v23 = vadd.f32 %v1775_v18, %v573_v22  ;;  %1395 = vmatprep.subr.bf16.mxu1 %v1834_v5  ;;  %v909_v18 = vld [vmem:[%s1930_s4] sm:$0xff]  ;;  %v1453_v5 = vmov 0.0|0.0  }
 0x138   :  { %v725_v25 = vmax.f32 %v579_v20, 0.0 }
 0x139   :  { %v724_v63 = vmax.f32 %v574_v23, 0.0 }
 0x13a   :  { %1397 = vmatpush3.bf16.msra.mxu1 %v1396_v36 }
 0x13b   :  { %v1400_v26 = vpack.c.bf16 %v725_v25, %v724_v63  ;;  %1399 = vmatprep.subr.bf16.mxu1 %v1842_v24  ;;  %v1411_v24 = vpack.c.bf16 %v910_v52, %v909_v18 }
 0x13e   :  { %1401 = vmatpush3.bf16.msra.mxu1 %v1400_v26 }
 0x13f   :  { %1403 = vmatprep.subr.bf16.mxu1 %v1848_v42  ;;  %v1455_v42 = vmov 0.0  }
 0x142   :  { %1405 = vmatpush3.bf16.msra.mxu1 %v1786_v40  ;;  %v911_v40 = vld [vmem:[%s1930_s4 + $0x10] sm:$0xff] }
 0x143   :  { %1407 = vmatprep.subr.bf16.mxu1 %v1854_v57 }
 0x146   :  { %1409 = vmatpush3.bf16.msra.mxu1 %v1794_v54 }
 0x147   :  { %1410 = vmatprep.subr.bf16.mxu1 %v1453_v5 }
 0x149   :  { %904 = vmatmul.mubr.f32.vlgmr.msra.gmra.mrb[22].mxu1 %v1770_v17  ;;  %v912_v17 = vld [vmem:[%s1930_s4 + $0x18] sm:$0xff]  ;;  %s1001_s4 = sshll.u32 %s1456_s20, 4  ;;  %s1002_s4 = int_to_ptr.vmem [resolvable:$true] %s1001_s4 }
 0x14a   :  { %1412 = vmatpush3.bf16.msra.mxu1 %v1411_v24  ;;  %v1414_v54 = vpack.c.bf16 %v912_v17, %v911_v40  ;;  %1335 = vmatprep.mubr.msk.f32.mxu1 %vm1454_vm2, %v1455_v42  ;;  %s1428_s21 = scalar_lea.vmem %s1002_s4, 32  ;;  %p1433_p1 = scmp.lt.s32.totalorder %s1002_s4, %s1002_s4 }
 0x14b   :  { %1413 = vmatprep.subr.bf16.mxu1 %v1453_v5  ;;  %p1429_p0 = scmp.ne.s32.totalorder %s1002_s4, %s1428_s21  ;;  %p1434_p2 = scmp.lt.s32.totalorder %s1428_s21, %s1428_s21 }
 0x14d   :  { %p1435_p3 = por %p1434_p2, %p1433_p1 }
 0x14e   :  { %1415 = vmatpush3.bf16.msra.mxu1 %v1414_v54 }
 0x14f   :  { %p1436_p4 = pnand %p1435_p3, %p1429_p0 }
 0x1fc   :  { %v1178_v57 = vpop.f32.mrb[20].mxu1 }
 0x1fd   :  { %v1179_v27 = vpop.f32.mrb[21].mxu1 }
 0x1fe   :  { %v1180_v28 = vadd.f32 %v1179_v27, %v1178_v57 }
 0x21c   :  { %v1213_v29 = vpop.f32.mrb[22].mxu1 }
 0x21d   :  { %v1214_v31 = vpop.f32.mrb[23].mxu1 }
 0x21e   :  { %v1215_v32 = vadd.f32 %v1214_v31, %v1213_v29 }
 0x220   :  { %v906_v13 = vadd.f32 %v1215_v32, %v1180_v28 }
 0x222   :  { %1336 = vmatmul.mubr.msk.f32.vlgmr.msra.gmra.mrb[24].mxu1 %vm920_vm3, %v906_v13 }
 0x2f5   :  { %v990_v34 = vpop.f32.mrb[24].mxu1 }
 0x2f6   :  { %v991_v37 = vadd.f32 %v1075_v33, %v990_v34  ;;  %v1337_v38 = vpop.f32.mrb[25].mxu1 }
 0x2f8   :  { %994 = vst [vmem:[#allocation2] sm:$0x3] %v991_v37 }
 0x2f9   :  { %1439 = shalt.err (!%p1436_p4)
}
 0x2fa   :  { %s1440_s24 = scalar_lea.hbm %s1932_s6, 32 }
 0x2fb   :  { %p1441_p5 = scmp.ne.s32.totalorder %s1932_s6, %s1440_s24  ;;  %p1444_p6 = scmp.lt.u32.totalorder %s1440_s24, %s1932_s6 }
 0x2fd   :  { %p1446_p7 = pnand %p1444_p6, %p1441_p5 }
 0x2ff   :  { %1449 = shalt.err (!%p1446_p7)
}
 0x300   :  { %1004 = dma.vmem_to_hbm [thread:$0]  %s1002_s4, 32, %s1932_s6, [#allocation3]  }
 0x301   :  { %1450 = dma.done.wait [#allocation3], 32  }
 0x302   :  { %1451 = vsyncadd [#allocation3], 4294967264 }
 0x303   :  { %1008 = vsyncpa [#allocation3], 1 }

</bundles_post_ra>
